<compile_context>
chip_gen: v6e
topology: v6e:2x2x1
jax: 0.10.0
libtpu: 0.0.40
codegen_flags: <defaults>
</compile_context>

<pallas_src>
import numpy as np
import jax
import jax.numpy as jnp
from jax.experimental import pallas as pl
from jax.experimental.pallas import tpu as pltpu


_TOTAL_VMEM_BUDGET = 24 * 1024 * 1024     # est. resident VMEM (2x-buffered blocks + acc)
_VMEM_LIMIT_BYTES = 48 * 1024 * 1024      # safe on v5e/v6e (128 MiB) and v7x (64 MiB)


# --------------------------------------------------------------------------------------
# Kernels
# --------------------------------------------------------------------------------------

def _maxpool_kernel(x_ref, o_ref):
    """No-mask mode. x_ref: (Bt, St, H); o_ref: (Bt, H) resident running max."""
    @pl.when(pl.program_id(1) == 0)
    def _init():
        o_ref[...] = jnp.full(o_ref.shape, -jnp.inf, dtype=o_ref.dtype)

    o_ref[...] = jnp.maximum(o_ref[...], jnp.max(x_ref[...], axis=1))


def _lengths_kernel(nt_ref, x_ref, lens_ref, o_ref):
    """Lengths mode. nt_ref: SMEM (grid_b,) seq-tiles needed per batch tile;
    x_ref: (Bt, St, H); lens_ref: (Bt, 1, 1) int32; o_ref: (Bt, H) running max."""
    i = pl.program_id(0)
    j = pl.program_id(1)

    @pl.when(j == 0)
    def _init():
        o_ref[...] = jnp.full(o_ref.shape, -jnp.inf, dtype=o_ref.dtype)

    @pl.when(j < nt_ref[i])                      # skip fully-padded trailing seq tiles
    def _compute():
        _, St, _ = x_ref.shape
        # global seq position of each sublane row of this block
        pos = jax.lax.broadcasted_iota(jnp.int32, (St, 1), 0) + j * St     # (St, 1)
        keep = pos < lens_ref[...]                                          # (Bt, St, 1)
        xm = jnp.where(keep, x_ref[...], -jnp.inf)                          # (Bt, St, H)
        o_ref[...] = jnp.maximum(o_ref[...], jnp.max(xm, axis=1))


def _masked2d_kernel(x_ref, bias_ref, o_ref):
    """2-D mask mode. bias_ref: (Bt, St, 1) bf16 additive bias (0 keep / -inf drop)."""
    @pl.when(pl.program_id(1) == 0)
    def _init():
        o_ref[...] = jnp.full(o_ref.shape, -jnp.inf, dtype=o_ref.dtype)

    xm = x_ref[...] + bias_ref[...].astype(x_ref.dtype)   # lane-broadcast of trailing-1 dim
    o_ref[...] = jnp.maximum(o_ref[...], jnp.max(xm, axis=1))


# --------------------------------------------------------------------------------------
# Block-size selection (VMEM-budget + layout aware)
# --------------------------------------------------------------------------------------

def _round_up(x, m):
    return ((x + m - 1) // m) * m


def _vmem_fits(bt, st, H, x_isz, mask_isz):
    x_blk = bt * st * H * x_isz
    out_blk = _round_up(bt, 8) * _round_up(H, 128) * x_isz
    mask_blk = 0
    if mask_isz:
        sub = {2: 16, 1: 32}.get(mask_isz, 8)
        mask_blk = bt * _round_up(st, sub) * 128 * mask_isz   # trailing-1 dim pads to 128 lanes
    total = 2 * x_blk + 2 * mask_blk + 2 * out_blk + 512 * 1024
    return total <= _TOTAL_VMEM_BUDGET


def _choose_blocks(B, S, H, x_isz, mask_isz=0, block_b=None, block_s=None):
    """Pick (Bt, St). Layout rules: Bt (output 2nd-minor) and St (x 2nd-minor) must be a
    multiple of the dtype's sublane packing or equal the full dim."""
    sub_x = {4: 8, 2: 16, 1: 32}.get(x_isz, 8)
    s_mult = max(sub_x, {2: 16, 1: 32}.get(mask_isz, 0)) if mask_isz else sub_x

    def bt_ok(d):
        return d == B or d % sub_x == 0

    def st_ok(d):
        return d == S or d % s_mult == 0

    if block_b is not None or block_s is not None:
        bt = B if block_b is None else int(block_b)
        st = S if block_s is None else int(block_s)
        if B % bt or S % st or not bt_ok(bt) or not st_ok(st):
            raise ValueError(f"invalid forced blocks (Bt={bt}, St={st}) for (B={B}, S={S})")
        return bt, st

    bt_cands = [d for d in range(B, 0, -1) if B % d == 0 and bt_ok(d)]
    st_cands = [d for d in range(S, 0, -1) if S % d == 0 and st_ok(d)]
    # keep >= 2 batch tiles when layout allows, so v7x's two TensorCores both get work
    preferred = [d for d in bt_cands if B // d >= 2] or bt_cands

    for bt in preferred:                       # largest batch tile whose full-S block fits
        if _vmem_fits(bt, S, H, x_isz, mask_isz):
            return bt, S
    bt = preferred[-1]                         # smallest layout-valid batch tile
    for st in st_cands:                        # then tile the sequence axis too
        if _vmem_fits(bt, st, H, x_isz, mask_isz):
            return bt, st
    return bt, st_cands[-1]                    # pathological shapes: smallest valid tile


# --------------------------------------------------------------------------------------
# Wrapper
# --------------------------------------------------------------------------------------

def max_pool_layer_forward(inputs, mask_or_lengths=None, *, block_b=None, block_s=None):
    """Pallas TPU equivalent of MaxPoolLayer.forward.
    inputs: (B, S, H) float; mask_or_lengths: None | (B,) lengths | (B, S) bool mask.
    Returns (B, H) of inputs.dtype."""
    B, S, H = inputs.shape
    if not jnp.issubdtype(inputs.dtype, jnp.floating):
        raise TypeError("max_pool_layer_forward requires a floating-point input dtype")
    x_isz = jnp.dtype(inputs.dtype).itemsize

    def cparams():
        return pltpu.CompilerParams(
            dimension_semantics=("parallel", "arbitrary"),
            vmem_limit_bytes=_VMEM_LIMIT_BYTES)

    out_shape = jax.ShapeDtypeStruct((B, H), inputs.dtype)

    # ---- mode A: no mask --------------------------------------------------------------
    if mask_or_lengths is None:
        Bt, St = _choose_blocks(B, S, H, x_isz, 0, block_b, block_s)
        grid = (B // Bt, S // St)
        return pl.pallas_call(
            _maxpool_kernel,
            out_shape=out_shape,
            grid_spec=pltpu.PrefetchScalarGridSpec(
                num_scalar_prefetch=0,
                grid=grid,
                in_specs=[pl.BlockSpec((Bt, St, H), lambda i, j: (i, j, 0))],
                out_specs=pl.BlockSpec((Bt, H), lambda i, j: (i, 0))),
            compiler_params=cparams(),
        )(inputs)

    m = jnp.asarray(mask_or_lengths)

    # ---- mode B: lengths --------------------------------------------------------------
    if m.ndim == 1:
        Bt, St = _choose_blocks(B, S, H, x_isz, 0, block_b, block_s)
        grid_b, grid_s = B // Bt, S // St
        lens = m.astype(jnp.int32)
        lens3 = lens.reshape(B, 1, 1)                                   # tiny VMEM operand
        # seq tiles actually needed per batch tile (for DMA + compute skipping)
        per_tile_max = jnp.max(lens.reshape(grid_b, Bt), axis=1)
        ntiles = jnp.clip((per_tile_max + St - 1) // St, 0, grid_s).astype(jnp.int32)

        def x_map(i, j, nt):
            # clamp the seq block index: repeated index => Pallas skips the DMA
            return (i, jnp.minimum(j, jnp.maximum(nt[i] - 1, 0)), 0)

        return pl.pallas_call(
            _lengths_kernel,
            out_shape=out_shape,
            grid_spec=pltpu.PrefetchScalarGridSpec(
                num_scalar_prefetch=1,
                grid=(grid_b, grid_s),
                in_specs=[
                    pl.BlockSpec((Bt, St, H), x_map),
                    pl.BlockSpec((Bt, 1, 1), lambda i, j, nt: (i, 0, 0)),
                ],
                out_specs=pl.BlockSpec((Bt, H), lambda i, j, nt: (i, 0))),
            compiler_params=cparams(),
        )(ntiles, inputs, lens3)

    # ---- mode C: 2-D boolean mask -----------------------------------------------------
    if m.ndim != 2:
        raise ValueError("mask_or_lengths must be None, 1-D lengths or a 2-D mask")
    # additive bias: 0 where kept, -inf where masked; bf16 halves the padded HBM traffic
    bias = jnp.where(m.astype(bool), -jnp.inf, 0.0).astype(jnp.bfloat16)[:, :, None]
    Bt, St = _choose_blocks(B, S, H, x_isz, 2, block_b, block_s)
    grid = (B // Bt, S // St)
    return pl.pallas_call(
        _masked2d_kernel,
        out_shape=out_shape,
        grid_spec=pltpu.PrefetchScalarGridSpec(
            num_scalar_prefetch=0,
            grid=grid,
            in_specs=[pl.BlockSpec((Bt, St, H), lambda i, j: (i, j, 0)),
                      pl.BlockSpec((Bt, St, 1), lambda i, j: (i, j, 0))],
            out_specs=pl.BlockSpec((Bt, H), lambda i, j: (i, 0))),
        compiler_params=cparams(),
    )(inputs, bias)


# --------------------------------------------------------------------------------------
# Reference + test
# --------------------------------------------------------------------------------------

def _reference(x, mask_or_lengths=None):
    """Pure numpy reference matching the PyTorch forward."""
    x = np.asarray(x, dtype=np.float32).copy()
    B, S, H = x.shape
    if mask_or_lengths is not None:
        m = np.asarray(mask_or_lengths)
        if m.ndim == 1:
            mask = np.arange(S)[None, :] >= m[:, None]
        else:
            mask = m.astype(bool)
        x = np.where(mask[:, :, None], -np.inf, x)
    return x.max(axis=1)


if __name__ == "__main__":
    B, S, H = 8, 64, 128
    key = jax.random.PRNGKey(0)
    k1, k2, k3 = jax.random.split(key, 3)

    x = jax.random.normal(k1, (B, S, H), dtype=jnp.float32)
    lengths = jax.random.randint(k2, (B,), 1, S + 1, dtype=jnp.int32)
    lengths_short = jnp.minimum(lengths, 16)            # exercises ragged DMA/compute skip
    mask2d = jax.random.bernoulli(k3, 0.3, (B, S))
    mask2d = mask2d.at[:, 0].set(False)                  # keep >= 1 valid position per row

    x_np = np.asarray(x)
    cases = [
        ("no-mask", None),
        ("lengths", lengths),
        ("lengths-short", lengths_short),
        ("2d-mask", mask2d),
    ]
    for name, marg in cases:
        ref = _reference(x_np, None if marg is None else np.asarray(marg))
        # default (large) blocks
        out = jax.block_until_ready(max_pool_layer_forward(x, marg))
        assert np.allclose(np.asarray(out), ref, atol=1e-6), f"{name}: default-block mismatch"
        # forced small blocks: exercises the multi-step seq reduction and DMA skipping
        out2 = jax.block_until_ready(
            max_pool_layer_forward(x, marg, block_b=8, block_s=32))
        assert np.allclose(np.asarray(out2), ref, atol=1e-6), f"{name}: small-block mismatch"

    print("KERNEL_OK")
</pallas_src>

<mosaic_0001>
module attributes {stable_mosaic.version = 11 : i64} {
  func.func @_maxpool_kernel(%arg0: i32, %arg1: i32, %arg2: memref<8x64x128xf32, #tpu.memory_space<vmem>>, %arg3: memref<8x128xf32, #tpu.memory_space<vmem>>) attributes {dimension_semantics = [#tpu.dimension_semantics<parallel>, #tpu.dimension_semantics<arbitrary>], iteration_bounds = array<i64: 1, 1>, scalar_prefetch = 0 : i64, scratch_operands = 0 : i64, tpu.core_type = #tpu.core_type<tc>, window_params = [{transform_indices = @transform_0, window_bounds = array<i64: 8, 64, 128>}, {transform_indices = @transform_1, window_bounds = array<i64: 8, 128>}]} {
    %c0_i32 = arith.constant 0 : i32
    %0 = arith.cmpi eq, %arg1, %c0_i32 : i32
    %1 = arith.extui %0 : i1 to i32
    %c0_i32_0 = arith.constant 0 : i32
    %2 = arith.cmpi ne, %1, %c0_i32_0 : i32
    scf.if %2 {
      %cst_7 = arith.constant 0xFF800000 : f32
      %8 = vector.broadcast %cst_7 : f32 to vector<8x128xf32>
      %c0_8 = arith.constant 0 : index
      %c0_9 = arith.constant 0 : index
      %9 = vector.load %arg3[%c0_8, %c0_9] : memref<8x128xf32, #tpu.memory_space<vmem>>, vector<8x128xf32>
      tpu.vector_store %arg3[%c0_8, %c0_9], %8 {strides = array<i32>} : memref<8x128xf32, #tpu.memory_space<vmem>>, vector<8x128xf32>,
    } else {
    }
    %c0 = arith.constant 0 : index
    %c0_1 = arith.constant 0 : index
    %3 = vector.load %arg3[%c0, %c0_1] : memref<8x128xf32, #tpu.memory_space<vmem>>, vector<8x128xf32>
    %c0_2 = arith.constant 0 : index
    %c0_3 = arith.constant 0 : index
    %c0_4 = arith.constant 0 : index
    %4 = vector.load %arg2[%c0_2, %c0_3, %c0_4] : memref<8x64x128xf32, #tpu.memory_space<vmem>>, vector<8x64x128xf32>
    %cst = arith.constant dense<0xFF800000> : vector<8x128xf32>
    %5 = vector.multi_reduction <maximumf>, %4, %cst [1] : vector<8x64x128xf32> to vector<8x128xf32>
    %6 = arith.maximumf %3, %5 : vector<8x128xf32>
    %c0_5 = arith.constant 0 : index
    %c0_6 = arith.constant 0 : index
    %7 = vector.load %arg3[%c0_5, %c0_6] : memref<8x128xf32, #tpu.memory_space<vmem>>, vector<8x128xf32>
    tpu.vector_store %arg3[%c0_5, %c0_6], %6 {strides = array<i32>} : memref<8x128xf32, #tpu.memory_space<vmem>>, vector<8x128xf32>,
    return
  }
  func.func @transform_0(%arg0: i32, %arg1: i32) -> (i32, i32, i32) {
    %c0_i32 = arith.constant 0 : i32
    %c0_i32_0 = arith.constant 0 : i32
    return %arg0, %arg1, %c0_i32 : i32, i32, i32
  }
  func.func @transform_1(%arg0: i32, %arg1: i32) -> (i32, i32) {
    %c0_i32 = arith.constant 0 : i32
    %c0_i32_0 = arith.constant 0 : i32
    return %arg0, %c0_i32 : i32, i32
  }
}

</mosaic_0001>

<bundles_post_ra>
// kernel: tpu_custom_call.1
= control target key start
LH: loop header
LB: loop body
LE: loop exit
PB: predicated region body
PF: predicated region fallthrough
CT: control target
= control target key end

     0   :  { %6 = vsyncpa [#allocation3], 0  ;;  %s306_s0 = inlined_call_operand.hbm [shape: f32[8,64,128], index: 0, kind: input, shape index: {}]   ;;  %s307_s1 = inlined_call_operand.hbm [shape: f32[8,128], index: 1, kind: output, shape index: {}]  }
   0x1   :  { %7 = vsyncpa [#allocation4], 0  ;;  %s286_s6 = smov [#allocation2]  }
   0x2   :  { %s13_s7 = sshll.u32 %s286_s6, 4  ;;  %s14_s7 = int_to_ptr.vmem [resolvable:$true] %s13_s7 }
   0x3   :  { %s250_s8 = scalar_lea.vmem %s14_s7, 8192  ;;  %p255_p1 = scmp.lt.s32.totalorder %s14_s7, %s14_s7 }
   0x4   :  { %p251_p0 = scmp.ne.s32.totalorder %s14_s7, %s250_s8  ;;  %p256_p2 = scmp.lt.s32.totalorder %s250_s8, %s250_s8 }
   0x6   :  { %p257_p3 = por %p256_p2, %p255_p1 }
   0x8   :  { %p258_p4 = pnand %p257_p3, %p251_p0 }
   0xa   :  { %261 = shalt.err (!%p258_p4)
}
   0xb   :  { %s287_s9 = smov 128   ;;  %s288_s10 = smov 8  }
   0xc   :  { %19 = dma.hbm_to_vmem [thread:$0]  %s306_s0, 8192, %s14_s7, [#allocation3], %s287_s9, %s287_s9, %s288_s10  }
   0xd   :  { %282 = dma.done.wait [#allocation3], 8192  }
   0xe   :  { %283 = vsyncadd [#allocation3], 4294959104  ;;  %v29_v0 = vld [vmem:[#allocation2] sm:$0xff]  ;;  %v30_v1 = vld [vmem:[#allocation2 + $0x8] sm:$0xff]  ;;  %vm205_vm0 = vcmask 1041409   ;;  %vm207_vm1 = vcmask 1042434  }
   0xf   :  { %v31_v2 = vld [vmem:[#allocation2 + $0x10] sm:$0xff]  ;;  %v93_v3 = vmax.f32 %v29_v0, %v30_v1  ;;  %v32_v4 = vld [vmem:[#allocation2 + $0x18] sm:$0xff]  ;;  %v37_v5 = vld [vmem:[#allocation2 + $0x40] sm:$0xff]  ;;  %vm209_vm2 = vcmask 1043459   ;;  %vm211_vm3 = vcmask 1044484   ;;  %vm213_vm4 = vcmask 1045509  }
  0x10   :  { %v38_v6 = vld [vmem:[#allocation2 + $0x48] sm:$0xff]  ;;  %v39_v7 = vld [vmem:[#allocation2 + $0x50] sm:$0xff]  ;;  %v33_v9 = vld [vmem:[#allocation2 + $0x20] sm:$0xff]  ;;  %vm215_vm5 = vcmask 1046534   ;;  %vm217_vm6 = vcmask 1047559   ;;  %s289_s0 = smov [#allocation5]  }
  0x11   :  { %v94_v8 = vmax.f32 %v93_v3, %v31_v2  ;;  %v106_v10 = vmax.f32 %v37_v5, %v38_v6  ;;  %v40_v11 = vld [vmem:[#allocation2 + $0x58] sm:$0xff]  ;;  %v45_v12 = vld [vmem:[#allocation2 + $0x80] sm:$0xff]  ;;  %v46_v13 = vld [vmem:[#allocation2 + $0x88] sm:$0xff]  ;;  %s228_s13 = sshll.u32 %s289_s0, 4  ;;  %s229_s13 = int_to_ptr.vmem [resolvable:$true] %s228_s13 }
  0x12   :  { %v34_v15 = vld [vmem:[#allocation2 + $0x28] sm:$0xff]  ;;  %v47_v16 = vld [vmem:[#allocation2 + $0x90] sm:$0xff]  ;;  %v119_v18 = vmax.f32 %v45_v12, %v46_v13  ;;  %v41_v20 = vld [vmem:[#allocation2 + $0x60] sm:$0xff]  ;;  %s262_s14 = scalar_lea.vmem %s229_s13, 128  ;;  %p267_p6 = scmp.lt.s32.totalorder %s229_s13, %s229_s13 }
  0x13   :  { %v95_v14 = vmax.f32 %v94_v8, %v32_v4  ;;  %v107_v17 = vmax.f32 %v106_v10, %v39_v7  ;;  %v35_v19 = vld [vmem:[#allocation2 + $0x30] sm:$0xff]  ;;  %v48_v21 = vld [vmem:[#allocation2 + $0x98] sm:$0xff]  ;;  %v53_v23 = vld [vmem:[#allocation2 + $0xc0] sm:$0xff]  ;;  %p263_p5 = scmp.ne.s32.totalorder %s229_s13, %s262_s14  ;;  %p268_p7 = scmp.lt.s32.totalorder %s262_s14, %s262_s14 }
  0x14   :  { %v54_v24 = vld [vmem:[#allocation2 + $0xc8] sm:$0xff]  ;;  %v55_v25 = vld [vmem:[#allocation2 + $0xd0] sm:$0xff]  ;;  %v120_v27 = vmax.f32 %v119_v18, %v47_v16  ;;  %v36_v28 = vld [vmem:[#allocation2 + $0x38] sm:$0xff] }
  0x15   :  { %v96_v22 = vmax.f32 %v95_v14, %v33_v9  ;;  %v108_v26 = vmax.f32 %v107_v17, %v40_v11  ;;  %v42_v29 = vld [vmem:[#allocation2 + $0x68] sm:$0xff]  ;;  %v49_v30 = vld [vmem:[#allocation2 + $0xa0] sm:$0xff]  ;;  %v132_v32 = vmax.f32 %v53_v23, %v54_v24  ;;  %v43_v33 = vld [vmem:[#allocation2 + $0x70] sm:$0xff]  ;;  %p269_p8 = por %p268_p7, %p267_p6 }
  0x16   :  { %v56_v34 = vld [vmem:[#allocation2 + $0xd8] sm:$0xff]  ;;  %v61_v35 = vld [vmem:[#allocation2 + $0x100] sm:$0xff]  ;;  %v121_v37 = vmax.f32 %v120_v27, %v48_v21  ;;  %v50_v38 = vld [vmem:[#allocation2 + $0xa8] sm:$0xff] }
  0x17   :  { %v97_v31 = vmax.f32 %v96_v22, %v34_v15  ;;  %v109_v36 = vmax.f32 %v108_v26, %v41_v20  ;;  %v62_v39 = vld [vmem:[#allocation2 + $0x108] sm:$0xff]  ;;  %v63_v40 = vld [vmem:[#allocation2 + $0x110] sm:$0xff]  ;;  %v133_v42 = vmax.f32 %v132_v32, %v55_v25  ;;  %v44_v43 = vld [vmem:[#allocation2 + $0x78] sm:$0xff]  ;;  %p270_p9 = pnand %p269_p8, %p263_p5 }
  0x18   :  { %v51_v44 = vld [vmem:[#allocation2 + $0xb0] sm:$0xff]  ;;  %v57_v45 = vld [vmem:[#allocation2 + $0xe0] sm:$0xff]  ;;  %v122_v47 = vmax.f32 %v121_v37, %v49_v30  ;;  %v145_v48 = vmax.f32 %v61_v35, %v62_v39  ;;  %v64_v49 = vld [vmem:[#allocation2 + $0x118] sm:$0xff] }
  0x19   :  { %v98_v41 = vmax.f32 %v97_v31, %v35_v19  ;;  %v110_v46 = vmax.f32 %v109_v36, %v42_v29  ;;  %v69_v50 = vld [vmem:[#allocation2 + $0x140] sm:$0xff]  ;;  %v70_v51 = vld [vmem:[#allocation2 + $0x148] sm:$0xff]  ;;  %v134_v53 = vmax.f32 %v133_v42, %v56_v34  ;;  %v52_v54 = vld [vmem:[#allocation2 + $0xb8] sm:$0xff] }
  0x1a   :  { %v58_v55 = vld [vmem:[#allocation2 + $0xe8] sm:$0xff]  ;;  %v71_v56 = vld [vmem:[#allocation2 + $0x150] sm:$0xff]  ;;  %v123_v58 = vmax.f32 %v122_v47, %v50_v38  ;;  %v146_v59 = vmax.f32 %v145_v48, %v63_v40  ;;  %v158_v60 = vmax.f32 %v69_v50, %v70_v51  ;;  %v65_v62 = vld [vmem:[#allocation2 + $0x120] sm:$0xff] }
  0x1b   :  { %v99_v52 = vmax.f32 %v98_v41, %v36_v28  ;;  %v111_v57 = vmax.f32 %v110_v46, %v43_v33  ;;  %v59_v61 = vld [vmem:[#allocation2 + $0xf0] sm:$0xff]  ;;  %v72_v63 = vld [vmem:[#allocation2 + $0x158] sm:$0xff]  ;;  %v135_v1 = vmax.f32 %v134_v53, %v57_v45  ;;  %v77_v2 = vld [vmem:[#allocation2 + $0x180] sm:$0xff] }
  0x1c   :  { %v78_v3 = vld [vmem:[#allocation2 + $0x188] sm:$0xff]  ;;  %v79_v4 = vld [vmem:[#allocation2 + $0x190] sm:$0xff]  ;;  %v124_v6 = vmax.f32 %v123_v58, %v51_v44  ;;  %v147_v7 = vmax.f32 %v146_v59, %v64_v49  ;;  %v159_v8 = vmax.f32 %v158_v60, %v71_v56  ;;  %v73_v10 = vld [vmem:[#allocation2 + $0x160] sm:$0xff] }
  0x1d   :  { %v100_v0 = vrot.slane %v99_v52, 4  ;;  %v112_v5 = vmax.f32 %v111_v57, %v44_v43  ;;  %v66_v9 = vld [vmem:[#allocation2 + $0x128] sm:$0xff]  ;;  %v136_v12 = vmax.f32 %v135_v1, %v58_v55  ;;  %v171_v13 = vmax.f32 %v77_v2, %v78_v3  ;;  %v60_v14 = vld [vmem:[#allocation2 + $0xf8] sm:$0xff]  ;;  %v85_v16 = vld [vmem:[#allocation2 + $0x1c0] sm:$0xff] }
  0x1e   :  { %v80_v15 = vld [vmem:[#allocation2 + $0x198] sm:$0xff]  ;;  %v125_v18 = vmax.f32 %v124_v6, %v52_v54  ;;  %v148_v19 = vmax.f32 %v147_v7, %v65_v62  ;;  %v160_v20 = vmax.f32 %v159_v8, %v72_v63  ;;  %v67_v21 = vld [vmem:[#allocation2 + $0x130] sm:$0xff]  ;;  %v74_v22 = vld [vmem:[#allocation2 + $0x168] sm:$0xff] }
  0x1f   :  { %v101_v11 = vmax.f32 %v99_v52, %v100_v0  ;;  %v113_v17 = vrot.slane %v112_v5, 4  ;;  %v86_v23 = vld [vmem:[#allocation2 + $0x1c8] sm:$0xff]  ;;  %v137_v25 = vmax.f32 %v136_v12, %v59_v61  ;;  %v172_v26 = vmax.f32 %v171_v13, %v79_v4  ;;  %v81_v27 = vld [vmem:[#allocation2 + $0x1a0] sm:$0xff]  ;;  %v87_v28 = vld [vmem:[#allocation2 + $0x1d0] sm:$0xff] }
  0x20   :  { %v126_v30 = vrot.slane %v125_v18, 4  ;;  %v149_v31 = vmax.f32 %v148_v19, %v66_v9  ;;  %v161_v32 = vmax.f32 %v160_v20, %v73_v10  ;;  %v68_v33 = vld [vmem:[#allocation2 + $0x138] sm:$0xff]  ;;  %v75_v34 = vld [vmem:[#allocation2 + $0x170] sm:$0xff]  ;;  %v184_v38 = vmax.f32 %v85_v16, %v86_v23  ;;  %v82_v39 = vld [vmem:[#allocation2 + $0x1a8] sm:$0xff] }
  0x21   :  { %v102_v24 = vrot.slane %v101_v11, 2  ;;  %v114_v29 = vmax.f32 %v112_v5, %v113_v17  ;;  %v138_v36 = vmax.f32 %v137_v25, %v60_v14  ;;  %v173_v37 = vmax.f32 %v172_v26, %v80_v15  ;;  %v88_v40 = vld [vmem:[#allocation2 + $0x1d8] sm:$0xff]  ;;  %v83_v50 = vld [vmem:[#allocation2 + $0x1b0] sm:$0xff]  ;;  %v89_v51 = vld [vmem:[#allocation2 + $0x1e0] sm:$0xff] }
  0x22   :  { %v127_v42 = vmax.f32 %v125_v18, %v126_v30  ;;  %v150_v43 = vmax.f32 %v149_v31, %v67_v21  ;;  %v162_v44 = vmax.f32 %v161_v32, %v74_v22  ;;  %v76_v45 = vld [vmem:[#allocation2 + $0x178] sm:$0xff]  ;;  %v185_v49 = vmax.f32 %v184_v38, %v87_v28  ;;  %v90_v61 = vld [vmem:[#allocation2 + $0x1e8] sm:$0xff]  ;;  %v91_v5 = vld [vmem:[#allocation2 + $0x1f0] sm:$0xff] }
  0x23   :  { %v103_v35 = vmax.f32 %v101_v11, %v102_v24  ;;  %v115_v41 = vrot.slane %v114_v29, 2  ;;  %v139_v47 = vrot.slane %v138_v36, 4  ;;  %v174_v48 = vmax.f32 %v173_v37, %v81_v27  ;;  %v84_v60 = vld [vmem:[#allocation2 + $0x1b8] sm:$0xff] }
  0x24   :  { %v128_v53 = vrot.slane %v127_v42, 2  ;;  %v151_v54 = vmax.f32 %v150_v43, %v68_v33  ;;  %v163_v55 = vmax.f32 %v162_v44, %v75_v34  ;;  %v186_v59 = vmax.f32 %v185_v49, %v88_v40  ;;  %v92_v13 = vld [vmem:[#allocation2 + $0x1f8] sm:$0xff] }
  0x25   :  { %v104_v46 = vrot.slane %v103_v35, 1  ;;  %v116_v52 = vmax.f32 %v114_v29, %v115_v41  ;;  %v140_v57 = vmax.f32 %v138_v36, %v139_v47  ;;  %v175_v58 = vmax.f32 %v174_v48, %v82_v39 }
  0x26   :  { %v129_v63 = vmax.f32 %v127_v42, %v128_v53  ;;  %v152_v0 = vrot.slane %v151_v54, 4  ;;  %v164_v1 = vmax.f32 %v163_v55, %v76_v45  ;;  %v187_v4 = vmax.f32 %v186_v59, %v89_v51 }
  0x27   :  { %v105_v56 = vmax.f32 %v103_v35, %v104_v46  ;;  %v117_v62 = vrot.slane %v116_v52, 1  ;;  %v141_v2 = vrot.slane %v140_v57, 2  ;;  %v176_v3 = vmax.f32 %v175_v58, %v83_v50 }
  0x28   :  { %v130_v7 = vrot.slane %v129_v63, 1  ;;  %v153_v8 = vmax.f32 %v151_v54, %v152_v0  ;;  %v165_v9 = vrot.slane %v164_v1, 4  ;;  %v188_v12 = vmax.f32 %v187_v4, %v90_v61 }
  0x29   :  { %v118_v6 = vmax.f32 %v116_v52, %v117_v62  ;;  %v142_v10 = vmax.f32 %v140_v57, %v141_v2  ;;  %v177_v11 = vmax.f32 %v176_v3, %v84_v60 }
  0x2a   :  { %v131_v14 = vmax.f32 %v129_v63, %v130_v7  ;;  %v154_v15 = vrot.slane %v153_v8, 2  ;;  %v166_v16 = vmax.f32 %v164_v1, %v165_v9  ;;  %v189_v20 = vmax.f32 %v188_v12, %v91_v5 }
  0x2b   :  { %v206_v17 = vsel %vm205_vm0, %v118_v6, %v105_v56  ;;  %v143_v18 = vrot.slane %v142_v10, 1  ;;  %v178_v19 = vrot.slane %v177_v11, 4 }
  0x2c   :  { %v155_v21 = vmax.f32 %v153_v8, %v154_v15  ;;  %v167_v22 = vrot.slane %v166_v16, 2  ;;  %v208_v23 = vsel %vm207_vm1, %v131_v14, %v206_v17  ;;  %v190_v26 = vmax.f32 %v189_v20, %v92_v13 }
  0x2d   :  { %v144_v24 = vmax.f32 %v142_v10, %v143_v18  ;;  %v179_v25 = vmax.f32 %v177_v11, %v178_v19 }
  0x2e   :  { %v156_v27 = vrot.slane %v155_v21, 1  ;;  %v168_v28 = vmax.f32 %v166_v16, %v167_v22  ;;  %v191_v30 = vrot.slane %v190_v26, 4 }
  0x2f   :  { %v180_v29 = vrot.slane %v179_v25, 2  ;;  %v210_v31 = vsel %vm209_vm2, %v144_v24, %v208_v23 }
  0x30   :  { %v157_v32 = vmax.f32 %v155_v21, %v156_v27  ;;  %v169_v33 = vrot.slane %v168_v28, 1  ;;  %v192_v35 = vmax.f32 %v190_v26, %v191_v30 }
  0x31   :  { %v181_v34 = vmax.f32 %v179_v25, %v180_v29 }
  0x32   :  { %v170_v36 = vmax.f32 %v168_v28, %v169_v33  ;;  %v212_v37 = vsel %vm211_vm3, %v157_v32, %v210_v31  ;;  %v193_v39 = vrot.slane %v192_v35, 2 }
  0x33   :  { %v182_v38 = vrot.slane %v181_v34, 1 }
  0x34   :  { %v194_v41 = vmax.f32 %v192_v35, %v193_v39  ;;  %v214_v42 = vsel %vm213_vm4, %v170_v36, %v212_v37 }
  0x35   :  { %v183_v40 = vmax.f32 %v181_v34, %v182_v38 }
  0x36   :  { %v195_v43 = vrot.slane %v194_v41, 1 }
  0x37   :  { %v216_v44 = vsel %vm215_vm5, %v183_v40, %v214_v42 }
  0x38   :  { %v196_v45 = vmax.f32 %v194_v41, %v195_v43 }
  0x3a   :  { %v218_v46 = vsel %vm217_vm6, %v196_v45, %v216_v44 }
  0x3b   :  { %221 = vst [vmem:[#allocation5] sm:$0xff] %v218_v46 }
  0x3c   :  { %273 = shalt.err (!%p270_p9)
}
  0x3d   :  { %231 = dma.vmem_to_hbm [thread:$0]  %s229_s13, 128, %s307_s1, [#allocation4]  }
  0x3e   :  { %284 = dma.done.wait [#allocation4], 128  }
  0x3f   :  { %285 = vsyncadd [#allocation4], 4294967168 }
  0x40   :  { %235 = vsyncpa [#allocation3], 1 }
  0x41   :  { %236 = vsyncpa [#allocation4], 1 }

</bundles_post_ra>
